<compile_context>
chip_gen: v6e
topology: v6e:2x2x1
jax: 0.10.0
libtpu: 0.0.40
codegen_flags: <defaults>
</compile_context>

<pallas_src>
import functools

import jax
import jax.numpy as jnp
from jax import lax
from jax.experimental import pallas as pl
from jax.experimental.pallas import tpu as pltpu

EPS = 1e-6

# Explicit VMEM budget: v7x has only 64 MiB physical VMEM, so cap the scoped limit at
# 48 MiB (well above the 16/32 MiB defaults) and size tiles against ~40 MiB working set.
VMEM_LIMIT_BYTES = 48 * 1024 * 1024
_TILE_VMEM_BUDGET = 40 * 1024 * 1024
_MAX_ROW_TILE = 1024

_COMPILER_PARAMS = pltpu.CompilerParams(
    dimension_semantics=("parallel",),      # grid steps are independent -> megacore-shardable
    vmem_limit_bytes=VMEM_LIMIT_BYTES,
)


def _choose_row_tile(n_rows, h, itemsize):
    """Largest row tile (multiple of 8, <= 1024) whose double-buffered set fits VMEM."""
    # Residual kernel streams up to 4 arrays (x, sublayer out, mask bits, out), each
    # double-buffered -> ~8 live buffers of (tile, h); count them at >= 4 B/elem.
    per_row = 8 * h * max(int(itemsize), 4)
    cap = max(8, min(_MAX_ROW_TILE, _TILE_VMEM_BUDGET // per_row))
    cap = (cap // 8) * 8
    padded_rows = pl.cdiv(n_rows, 8) * 8
    return int(min(cap, padded_rows))


def _pad_rows(a, n_pad):
    n = a.shape[0]
    if n == n_pad:
        return a
    return jnp.pad(a, ((0, n_pad - n), (0, 0)))


# ----------------------------- LayerNorm kernel ----------------------------- #
def _layernorm_kernel(x_ref, g_ref, b_ref, o_ref, *, eps):
    x = x_ref[...].astype(jnp.float32)                       # (row_tile, H)
    h = x.shape[-1]
    mean = jnp.mean(x, axis=-1, keepdims=True)
    d = x - mean
    # torch.std default is the unbiased estimator (divide by H-1); module then does
    # (x - mean) / sqrt(std**2 + eps)  ==  (x - mean) * rsqrt(var_unbiased + eps).
    var = jnp.sum(d * d, axis=-1, keepdims=True) * (1.0 / (h - 1))
    y = g_ref[...].astype(jnp.float32) * (d * lax.rsqrt(var + eps)) \
        + b_ref[...].astype(jnp.float32)
    o_ref[...] = y.astype(o_ref.dtype)


def layernorm_pallas(x2d, gamma, beta, row_tile):
    n, h = x2d.shape
    assert n % row_tile == 0
    g2d = gamma.reshape(1, h)
    b2d = beta.reshape(1, h)
    return pl.pallas_call(
        functools.partial(_layernorm_kernel, eps=EPS),
        out_shape=jax.ShapeDtypeStruct((n, h), x2d.dtype),
        grid=(n // row_tile,),
        in_specs=[
            pl.BlockSpec((row_tile, h), lambda i: (i, 0)),
            pl.BlockSpec((1, h), lambda i: (0, 0)),
            pl.BlockSpec((1, h), lambda i: (0, 0)),
        ],
        out_specs=pl.BlockSpec((row_tile, h), lambda i: (i, 0)),
        compiler_params=_COMPILER_PARAMS,
    )(x2d, g2d, b2d)


# ----------------------- residual (+ dropout) kernels ------------------------ #
def _residual_add_kernel(x_ref, s_ref, o_ref):
    o_ref[...] = (x_ref[...].astype(jnp.float32)
                  + s_ref[...].astype(jnp.float32)).astype(o_ref.dtype)


def _residual_dropout_kernel(x_ref, s_ref, bits_ref, o_ref, *, p):
    # Integer-domain keep test: keep iff bits >= p * 2^32  (P(keep) = 1 - p).
    thresh = jnp.uint32(min(int(round(p * (2.0 ** 32))), 2 ** 32 - 1))
    keep = bits_ref[...] >= thresh
    s = jnp.where(keep, s_ref[...].astype(jnp.float32) * (1.0 / (1.0 - p)), 0.0)
    o_ref[...] = (x_ref[...].astype(jnp.float32) + s).astype(o_ref.dtype)


def residual_add_pallas(x2d, s2d, row_tile):
    n, h = x2d.shape
    assert n % row_tile == 0
    return pl.pallas_call(
        _residual_add_kernel,
        out_shape=jax.ShapeDtypeStruct((n, h), x2d.dtype),
        grid=(n // row_tile,),
        in_specs=[
            pl.BlockSpec((row_tile, h), lambda i: (i, 0)),   # x (residual)
            pl.BlockSpec((row_tile, h), lambda i: (i, 0)),   # sublayer output
        ],
        out_specs=pl.BlockSpec((row_tile, h), lambda i: (i, 0)),
        compiler_params=_COMPILER_PARAMS,
    )(x2d, s2d)


def residual_dropout_pallas(x2d, s2d, bits, dropout_p, row_tile):
    n, h = x2d.shape
    assert n % row_tile == 0
    kernel = functools.partial(_residual_dropout_kernel, p=float(dropout_p))
    return pl.pallas_call(
        kernel,
        out_shape=jax.ShapeDtypeStruct((n, h), x2d.dtype),
        grid=(n // row_tile,),
        in_specs=[
            pl.BlockSpec((row_tile, h), lambda i: (i, 0)),   # x (residual)
            pl.BlockSpec((row_tile, h), lambda i: (i, 0)),   # sublayer output
            pl.BlockSpec((row_tile, h), lambda i: (i, 0)),   # uint32 random bits
        ],
        out_specs=pl.BlockSpec((row_tile, h), lambda i: (i, 0)),
        compiler_params=_COMPILER_PARAMS,
    )(x2d, s2d, bits)


# ------------------------------ module wrapper ------------------------------ #
def sublayer_connection(x, sublayer_fn, gamma, beta, *, dropout_p, seed, training):
    """out = x + dropout(sublayer_fn(LayerNorm(x))), x: (B, S, H)."""
    b, s, h = x.shape
    n = b * s
    x2d = x.reshape(n, h)

    row_tile = _choose_row_tile(n, h, jnp.dtype(x.dtype).itemsize)
    n_pad = pl.cdiv(n, row_tile) * row_tile
    x2d_p = _pad_rows(x2d, n_pad)

    normed = layernorm_pallas(x2d_p, gamma, beta, row_tile)[:n].reshape(b, s, h)
    sub_out = sublayer_fn(normed).reshape(n, h)
    sub_out_p = _pad_rows(sub_out, n_pad)

    if training and dropout_p > 0.0:
        # Random bits come from jax.random (in-kernel pltpu.prng_* has no interpret/CPU
        # lowering); the keep-test, scale and residual add stay fused in the kernel.
        bits = jax.random.bits(jax.random.PRNGKey(seed), (n_pad, h), dtype=jnp.uint32)
        out = residual_dropout_pallas(x2d_p, sub_out_p, bits, dropout_p, row_tile)
    else:
        out = residual_add_pallas(x2d_p, sub_out_p, row_tile)

    return out[:n].reshape(b, s, h)


# --------------------------------- reference --------------------------------- #
def _reference(x, sublayer_fn, gamma, beta):
    mean = jnp.mean(x, axis=-1, keepdims=True)
    d = x - mean
    var = jnp.sum(d * d, axis=-1, keepdims=True) / (x.shape[-1] - 1)   # unbiased, as torch.std
    normed = gamma * (d / jnp.sqrt(var + EPS)) + beta
    return x + sublayer_fn(normed)  # dropout disabled (eval mode)


if __name__ == "__main__":
    B, S, H = 2, 8, 128
    key = jax.random.PRNGKey(0)
    kx, kw, kb = jax.random.split(key, 3)

    x = jax.random.normal(kx, (B, S, H), dtype=jnp.float32)

    # LayerNorm parameters (deterministic init matching the module: ones / zeros).
    gamma = jnp.ones((H,), dtype=jnp.float32)
    beta = jnp.zeros((H,), dtype=jnp.float32)

    # Deterministic example sublayer: a Linear(H -> H), standing in for the
    # attention / feed-forward sublayer that SublayerConnection wraps.
    w_sub = jax.random.normal(kw, (H, H), dtype=jnp.float32) * 0.02
    b_sub = jax.random.normal(kb, (H,), dtype=jnp.float32) * 0.02
    sublayer_fn = lambda y: jnp.einsum("bsh,hk->bsk", y, w_sub) + b_sub

    dropout_p = 0.1

    # Eval-mode run (dropout off) so the result can be checked against a reference.
    out_eval = sublayer_connection(
        x, sublayer_fn, gamma, beta, dropout_p=dropout_p, seed=0, training=False
    )
    out_eval = jax.block_until_ready(out_eval)
    ref = _reference(x, sublayer_fn, gamma, beta)
    assert jnp.allclose(out_eval, ref, atol=1e-4, rtol=1e-4), "mismatch vs reference"

    # Training-mode run exercising the fused dropout + residual path.
    out_train = sublayer_connection(
        x, sublayer_fn, gamma, beta, dropout_p=dropout_p, seed=1234, training=True
    )
    out_train = jax.block_until_ready(out_train)
    assert out_train.shape == x.shape
    assert bool(jnp.all(jnp.isfinite(out_train)))

    print("KERNEL_OK")
</pallas_src>

<mosaic_0001>
module attributes {stable_mosaic.version = 11 : i64} {
  func.func @_layernorm_kernel(%arg0: i32, %arg1: memref<16x128xf32, #tpu.memory_space<vmem>>, %arg2: memref<1x128xf32, #tpu.memory_space<vmem>>, %arg3: memref<1x128xf32, #tpu.memory_space<vmem>>, %arg4: memref<16x128xf32, #tpu.memory_space<vmem>>) attributes {dimension_semantics = [#tpu.dimension_semantics<parallel>], iteration_bounds = array<i64: 1>, scalar_prefetch = 0 : i64, scratch_operands = 0 : i64, tpu.core_type = #tpu.core_type<tc>, window_params = [{transform_indices = @transform_0, window_bounds = array<i64: 16, 128>}, {pipeline_mode = #tpu.pipeline_mode<synchronous>, transform_indices = @transform_1, window_bounds = array<i64: 1, 128>}, {pipeline_mode = #tpu.pipeline_mode<synchronous>, transform_indices = @transform_2, window_bounds = array<i64: 1, 128>}, {transform_indices = @transform_3, window_bounds = array<i64: 16, 128>}]} {
    %c0 = arith.constant 0 : index
    %c0_0 = arith.constant 0 : index
    %0 = vector.load %arg1[%c0, %c0_0] : memref<16x128xf32, #tpu.memory_space<vmem>>, vector<16x128xf32>
    %cst = arith.constant dense<0.000000e+00> : vector<16xf32>
    %1 = vector.multi_reduction <add>, %0, %cst [1] : vector<16x128xf32> to vector<16xf32>
    %2 = vector.shape_cast %1 : vector<16xf32> to vector<16x1xf32>
    %cst_1 = arith.constant 1.280000e+02 : f32
    %3 = vector.broadcast %cst_1 : f32 to vector<16x1xf32>
    %4 = arith.divf %2, %3 : vector<16x1xf32>
    %5 = vector.broadcast %4 : vector<16x1xf32> to vector<16x128xf32>
    %6 = arith.subf %0, %5 : vector<16x128xf32>
    %7 = arith.mulf %6, %6 : vector<16x128xf32>
    %cst_2 = arith.constant dense<0.000000e+00> : vector<16xf32>
    %8 = vector.multi_reduction <add>, %7, %cst_2 [1] : vector<16x128xf32> to vector<16xf32>
    %9 = vector.shape_cast %8 : vector<16xf32> to vector<16x1xf32>
    %cst_3 = arith.constant 0.00787401571 : f32
    %10 = vector.broadcast %cst_3 : f32 to vector<16x1xf32>
    %11 = arith.mulf %9, %10 : vector<16x1xf32>
    %c0_4 = arith.constant 0 : index
    %c0_5 = arith.constant 0 : index
    %12 = vector.load %arg2[%c0_4, %c0_5] : memref<1x128xf32, #tpu.memory_space<vmem>>, vector<1x128xf32>
    %cst_6 = arith.constant 9.99999997E-7 : f32
    %13 = vector.broadcast %cst_6 : f32 to vector<16x1xf32>
    %14 = arith.addf %11, %13 : vector<16x1xf32>
    %15 = math.rsqrt %14 : vector<16x1xf32>
    %16 = vector.broadcast %15 : vector<16x1xf32> to vector<16x128xf32>
    %17 = arith.mulf %6, %16 : vector<16x128xf32>
    %18 = vector.broadcast %12 : vector<1x128xf32> to vector<16x128xf32>
    %19 = arith.mulf %18, %17 : vector<16x128xf32>
    %c0_7 = arith.constant 0 : index
    %c0_8 = arith.constant 0 : index
    %20 = vector.load %arg3[%c0_7, %c0_8] : memref<1x128xf32, #tpu.memory_space<vmem>>, vector<1x128xf32>
    %21 = vector.broadcast %20 : vector<1x128xf32> to vector<16x128xf32>
    %22 = arith.addf %19, %21 : vector<16x128xf32>
    %c0_9 = arith.constant 0 : index
    %c0_10 = arith.constant 0 : index
    %23 = vector.load %arg4[%c0_9, %c0_10] : memref<16x128xf32, #tpu.memory_space<vmem>>, vector<16x128xf32>
    tpu.vector_store %arg4[%c0_9, %c0_10], %22 {strides = array<i32>} : memref<16x128xf32, #tpu.memory_space<vmem>>, vector<16x128xf32>,
    return
  }
  func.func @transform_0(%arg0: i32) -> (i32, i32) {
    %c0_i32 = arith.constant 0 : i32
    %c0_i32_0 = arith.constant 0 : i32
    return %arg0, %c0_i32 : i32, i32
  }
  func.func @transform_1(%arg0: i32) -> (i32, i32) {
    %c0_i32 = arith.constant 0 : i32
    %c0_i32_0 = arith.constant 0 : i32
    %c0_i32_1 = arith.constant 0 : i32
    return %c0_i32, %c0_i32_0 : i32, i32
  }
  func.func @transform_2(%arg0: i32) -> (i32, i32) {
    %c0_i32 = arith.constant 0 : i32
    %c0_i32_0 = arith.constant 0 : i32
    %c0_i32_1 = arith.constant 0 : i32
    return %c0_i32, %c0_i32_0 : i32, i32
  }
  func.func @transform_3(%arg0: i32) -> (i32, i32) {
    %c0_i32 = arith.constant 0 : i32
    %c0_i32_0 = arith.constant 0 : i32
    return %arg0, %c0_i32 : i32, i32
  }
}

</mosaic_0001>

<bundles_post_ra>
// kernel: tpu_custom_call.1
= control target key start
LH: loop header
LB: loop body
LE: loop exit
PB: predicated region body
PF: predicated region fallthrough
CT: control target
= control target key end

     0   :  { %8 = vsyncpa [#allocation3], 0  ;;  %s187_s0 = inlined_call_operand.hbm [shape: f32[16,128], index: 0, kind: input, shape index: {}]   ;;  %s188_s1 = inlined_call_operand.vmem [shape: f32[1,128], index: 1, kind: input, shape index: {}]   ;;  %s189_s2 = inlined_call_operand.vmem [shape: f32[1,128], index: 2, kind: input, shape index: {}]   ;;  %s190_s3 = inlined_call_operand.hbm [shape: f32[16,128], index: 3, kind: output, shape index: {}]  }
   0x1   :  { %9 = vsyncpa [#allocation4], 0  ;;  %s145_s12 = smov [#allocation2]  }
   0x2   :  { %s15_s13 = sshll.u32 %s145_s12, 4  ;;  %s16_s13 = int_to_ptr.vmem [resolvable:$true] %s15_s13 }
   0x3   :  { %s109_s14 = scalar_lea.vmem %s16_s13, 256  ;;  %p114_p1 = scmp.lt.s32.totalorder %s16_s13, %s16_s13 }
   0x4   :  { %p110_p0 = scmp.ne.s32.totalorder %s16_s13, %s109_s14  ;;  %p115_p2 = scmp.lt.s32.totalorder %s109_s14, %s109_s14 }
   0x6   :  { %p116_p3 = por %p115_p2, %p114_p1 }
   0x8   :  { %p117_p4 = pnand %p116_p3, %p110_p0 }
   0xa   :  { %120 = shalt.err (!%p117_p4)
}
   0xb   :  { %s146_s15 = smov 128   ;;  %s147_s16 = smov 8  }
   0xc   :  { %21 = dma.hbm_to_vmem [thread:$0]  %s187_s0, 256, %s16_s13, [#allocation3], %s146_s15, %s146_s15, %s147_s16  }
   0xd   :  { %141 = dma.done.wait [#allocation3], 256  }
   0xe   :  { %142 = vsyncadd [#allocation3], 4294967040  ;;  %v29_v0 = vld [vmem:[#allocation2] sm:$0xff]  ;;  %v30_v1 = vld [vmem:[#allocation2 + $0x8] sm:$0xff]  ;;  %s148_s22 = smov [#allocation5]  }
   0xf   :  { %31 = vadd.xlane.f32.xlu0 %v29_v0  ;;  %v91_v17 = vld [vmem:[%s188_s1] ss:$0 sm:$0xff]  ;;  %s79_s23 = sshll.u32 %s148_s22, 4  ;;  %s80_s23 = int_to_ptr.vmem [resolvable:$true] %s79_s23 }
  0x10   :  { %v92_v19 = vld [vmem:[%s189_s2] ss:$0 sm:$0xff]  ;;  %s121_s24 = scalar_lea.vmem %s80_s23, 256  ;;  %p126_p6 = scmp.lt.s32.totalorder %s80_s23, %s80_s23 }
  0x11   :  { %p122_p5 = scmp.ne.s32.totalorder %s80_s23, %s121_s24  ;;  %p127_p7 = scmp.lt.s32.totalorder %s121_s24, %s121_s24 }
  0x13   :  { %33 = vadd.xlane.f32.xlu0 %v30_v1  ;;  %p128_p8 = por %p127_p7, %p126_p6 }
  0x15   :  { %p129_p9 = pnand %p128_p8, %p122_p5 }
  0x98   :  { %v32_v2 = vpop.xlane.xlu0 %31 }
  0x99   :  { %v36_v3 = vmul.f32 0.0078125, %v32_v2 }
  0x9b   :  { %v38_v4 = vsub.f32 %v29_v0, %v36_v3 }
  0x9c   :  { %v34_v5 = vpop.xlane.xlu0 %33 }
  0x9d   :  { %v37_v6 = vmul.f32 0.0078125, %v34_v5  ;;  %v40_v7 = vmul.f32 %v38_v4, %v38_v4 }
  0x9f   :  { %v39_v8 = vsub.f32 %v30_v1, %v37_v6  ;;  %42 = vadd.xlane.f32.xlu1 %v40_v7 }
  0xa1   :  { %v41_v9 = vmul.f32 %v39_v8, %v39_v8 }
  0xa3   :  { %44 = vadd.xlane.f32.xlu1 %v41_v9 }
 0x128   :  { %v43_v10 = vpop.xlane.xlu1 %42 }
 0x129   :  { %v46_v11 = vmul.f32 0.007874016, %v43_v10 }
 0x12b   :  { %v49_v12 = vadd.f32 1e-06, %v46_v11 }
 0x12c   :  { %v45_v13 = vpop.xlane.xlu1 %44 }
 0x12d   :  { %97 = vrsqrt.f32 %v49_v12  ;;  %v47_v14 = vmul.f32 0.007874016, %v45_v13 }
 0x12f   :  { %v50_v15 = vadd.f32 1e-06, %v47_v14 }
 0x131   :  { %99 = vrsqrt.f32 %v50_v15 }
 0x13a   :  { %v98_v16 = vpop.eup %97 }
 0x13b   :  { %v53_v18 = vmul.f32 %v98_v16, %v38_v4 }
 0x13d   :  { %v61_v20 = vmul.f32 %v91_v17, %v53_v18 }
 0x13e   :  { %v100_v21 = vpop.eup %99 }
 0x13f   :  { %v54_v22 = vmul.f32 %v100_v21, %v39_v8  ;;  %v70_v23 = vadd.f32 %v92_v19, %v61_v20 }
 0x141   :  { %v62_v24 = vmul.f32 %v91_v17, %v54_v22  ;;  %72 = vst [vmem:[#allocation5] sm:$0xff] %v70_v23 }
 0x143   :  { %v71_v25 = vadd.f32 %v92_v19, %v62_v24 }
 0x145   :  { %73 = vst [vmem:[#allocation5 + $0x8] sm:$0xff] %v71_v25 }
 0x146   :  { %132 = shalt.err (!%p129_p9)
}
 0x147   :  { %85 = dma.vmem_to_hbm [thread:$0]  %s80_s23, 256, %s190_s3, [#allocation4], %s146_s15, %s146_s15, %s147_s16  }
 0x148   :  { %143 = dma.done.wait [#allocation4], 256  }
 0x149   :  { %144 = vsyncadd [#allocation4], 4294967040 }
 0x14a   :  { %89 = vsyncpa [#allocation3], 1 }
 0x14b   :  { %90 = vsyncpa [#allocation4], 1 }

</bundles_post_ra>
